<compile_context>
chip_gen: v6e
topology: v6e:2x2x1
jax: 0.10.0
libtpu: 0.0.40
codegen_flags: <defaults>
</compile_context>

<pallas_src>
import functools

import jax
import jax.numpy as jnp
import numpy as np
from jax import lax
from jax.experimental import pallas as pl
from jax.experimental.pallas import tpu as pltpu

_EPS = 1e-8                 # GlobLN = nn.GroupNorm(1, C, eps=1e-08)
_HALO = 128                 # lane-aligned zero halo padded around x ( >= (K-1)//2 )
_FUSED_VMEM_BUDGET = 48 << 20   # fall back to the L-tiled path above this estimate


def _pad_input(x, l_padded):
    """(B, nIn, L) f32 -> (B, nIn, HALO + l_padded + HALO) bf16 with zero halos."""
    _, _, length = x.shape
    return jnp.pad(x.astype(jnp.bfloat16),
                   ((0, 0), (0, 0), (_HALO, l_padded - length + _HALO)))


# ----------------------------------------------------------------------------
# Path A: fully fused, whole L per batch element (fits VMEM).
# ----------------------------------------------------------------------------
def _fused_kernel(x_ref, w_ref, b_ref, g_ref, beta_ref, alpha_ref, o_ref,
                  im2col_ref, *, ksize, l_valid):
    """One batch element: Conv1d('same') + GlobLN + PReLU, fully fused.

    x_ref:      (nIn, HALO + L_tile + HALO) bf16  zero-haloed input
    w_ref:      (nOut, K*nIn)               bf16  conv weight, [co, k*nIn + ci]
    b/g/beta:   (nOut, 1)                   f32
    alpha_ref:  (1,)                        f32   PReLU slope (SMEM scalar)
    o_ref:      (nOut, L_tile)              f32   output block (epilogue in-place)
    im2col_ref: (K*nIn, L_tile)             bf16  scratch slab
    """
    n_out, l_tile = o_ref.shape
    n_in = x_ref.shape[0]
    pad = (ksize - 1) // 2

    # im2col: K statically lane-shifted windows of the zero-haloed input.
    # Halos already hold the 'same'-conv zeros -> no roll, no edge masks.
    for k in range(ksize):
        d = k - pad
        im2col_ref[k * n_in:(k + 1) * n_in, :] = (
            x_ref[:, _HALO + d:_HALO + d + l_tile])

    # Conv1d as ONE deep MXU matmul (contraction K*nIn), f32 accumulation,
    # written straight into the output block (no separate accumulator scratch).
    o_ref[...] = jnp.dot(w_ref[...], im2col_ref[...],
                         preferred_element_type=jnp.float32) + b_ref[...]

    # GlobLN == GroupNorm(1, C), eps=1e-8; two-pass stats over the valid region.
    a = o_ref[...]
    inv_n = 1.0 / float(n_out * l_valid)
    if l_valid == l_tile:                       # no lane padding -> no masks
        mean = jnp.sum(a) * inv_n
        c = a - mean
        var = jnp.sum(c * c) * inv_n
    else:
        col = lax.broadcasted_iota(jnp.int32, (n_out, l_tile), 1)
        vmask = col < l_valid
        mean = jnp.sum(jnp.where(vmask, a, 0.0)) * inv_n
        c = a - mean
        var = jnp.sum(jnp.where(vmask, c * c, 0.0)) * inv_n
    inv_std = lax.rsqrt(jnp.maximum(var, 0.0) + _EPS)

    # Folded affine (2 elementwise passes) + PReLU.
    s = g_ref[...] * inv_std                    # (nOut, 1)
    z = c * s + beta_ref[...]
    alpha = alpha_ref[0]
    o_ref[...] = jnp.where(z >= 0, z, alpha * z)


# ----------------------------------------------------------------------------
# Path B: L-tiled, two passes (for shapes whose per-batch slab won't fit VMEM).
# ----------------------------------------------------------------------------
def _conv_stats_kernel(x_ref, w_ref, b_ref, y_ref, part_ref, *,
                       ksize, l_block, l_valid, l_padded):
    """Pass 1 for one (batch, L-tile): Conv1d('same') + bias and stat partials.

    x_ref:    (nIn, HALO + L_padded + HALO) bf16  full-length, resident across L tiles
    w_ref:    (K, nOut, nIn)                bf16
    b_ref:    (nOut, 1)                     f32
    y_ref:    (nOut, l_block)               f32   conv output tile
    part_ref: (1, 2)                        f32   [sum, sumsq] over this tile's valid cols
    """
    n_out = y_ref.shape[0]
    pad = (ksize - 1) // 2
    l = pl.program_id(1)

    # Load tile + halos at a 128-aligned dynamic offset; static per-tap slices
    # feed K accumulating MXU matmuls (no materialized im2col slab).
    base = pl.multiple_of(l * l_block, 128)
    xh = x_ref[:, pl.ds(base, l_block + 2 * _HALO)]
    acc = None
    for k in range(ksize):
        d = k - pad
        p = jnp.dot(w_ref[k], xh[:, _HALO + d:_HALO + d + l_block],
                    preferred_element_type=jnp.float32)
        acc = p if acc is None else acc + p
    y = acc + b_ref[...]
    y_ref[...] = y

    # Partial GroupNorm statistics (mask only exists when L has lane padding).
    if l_valid != l_padded:
        col = l * l_block + lax.broadcasted_iota(jnp.int32, (n_out, l_block), 1)
        ym = jnp.where(col < l_valid, y, 0.0)
    else:
        ym = y
    ps = jnp.sum(jnp.sum(ym, axis=1, keepdims=True), axis=0, keepdims=True)
    pss = jnp.sum(jnp.sum(ym * ym, axis=1, keepdims=True), axis=0, keepdims=True)
    part_ref[:, 0:1] = ps
    part_ref[:, 1:2] = pss


def _norm_act_kernel(stats_ref, y_ref, g_ref, beta_ref, alpha_ref, o_ref):
    """Pass 2 for one (batch, L-tile): folded GlobLN affine + PReLU.

    stats_ref: (B, 2) f32 SMEM  -- [mean, inv_std] per batch element
    """
    b = pl.program_id(0)
    mean = stats_ref[b, 0]
    inv_std = stats_ref[b, 1]
    s = g_ref[...] * inv_std                    # (nOut, 1)
    t = beta_ref[...] - mean * s
    z = y_ref[...] * s + t
    alpha = alpha_ref[0]
    o_ref[...] = jnp.where(z >= 0, z, alpha * z)


# ----------------------------------------------------------------------------
# Wrapper
# ----------------------------------------------------------------------------
def conv_norm_act(x, weight, bias, gamma, beta, alpha, *, ksize, stride=1,
                  groups=1, l_block=None, force_tiled=False):
    """Fused Conv1d + GroupNorm(1, nOut, eps=1e-8) + PReLU.

    x:      (B, nIn, L)     float32
    weight: (nOut, nIn, K)  float32  (PyTorch Conv1d layout)
    bias, gamma, beta: (nOut,) float32 ; alpha: (1,) float32 PReLU slope
    returns (B, nOut, L)    float32
    """
    assert stride == 1, "only stride=1 implemented"
    assert groups == 1, "only groups=1 implemented"
    assert ksize % 2 == 1, "only odd kSize ('same' conv) implemented"
    # TODO(synk): stride > 1, groups > 1 and even kSize are not wired.
    pad_k = (ksize - 1) // 2
    assert pad_k <= _HALO

    b, n_in, length = x.shape
    n_out = weight.shape[0]

    bias = jnp.asarray(bias, jnp.float32).reshape(n_out, 1)
    gamma = jnp.asarray(gamma, jnp.float32).reshape(n_out, 1)
    beta = jnp.asarray(beta, jnp.float32).reshape(n_out, 1)
    alpha = jnp.asarray(alpha, jnp.float32).reshape(1)

    # ---- fused-path VMEM estimate (bf16 x + bf16 im2col + f32 out) ----------
    l_tile = 128 * pl.cdiv(length, 128)
    x_bytes = n_in * (l_tile + 2 * _HALO) * 2
    w_bytes = n_out * ksize * n_in * 2
    out_bytes = n_out * l_tile * 4
    im2col_bytes = ksize * n_in * l_tile * 2
    fused_est = 2 * x_bytes + 2 * w_bytes + 3 * out_bytes + im2col_bytes
    use_tiled = force_tiled or fused_est > _FUSED_VMEM_BUDGET

    if not use_tiled:
        # ---------------- Path A: fully fused, whole L per batch ------------
        x_work = _pad_input(x, l_tile)
        w_flat = jnp.transpose(weight, (0, 2, 1)).reshape(n_out, ksize * n_in)
        w_flat = w_flat.astype(jnp.bfloat16)
        kernel = functools.partial(_fused_kernel, ksize=ksize, l_valid=length)
        vmem_limit = int(min(max(fused_est * 3 // 2 + (4 << 20), 32 << 20),
                             128 << 20))
        out = pl.pallas_call(
            kernel,
            out_shape=jax.ShapeDtypeStruct((b, n_out, l_tile), jnp.float32),
            grid_spec=pltpu.PrefetchScalarGridSpec(
                num_scalar_prefetch=0,
                grid=(b,),
                in_specs=[
                    pl.BlockSpec((None, n_in, l_tile + 2 * _HALO),
                                 lambda i: (i, 0, 0)),
                    pl.BlockSpec((n_out, ksize * n_in), lambda i: (0, 0)),
                    pl.BlockSpec((n_out, 1), lambda i: (0, 0)),
                    pl.BlockSpec((n_out, 1), lambda i: (0, 0)),
                    pl.BlockSpec((n_out, 1), lambda i: (0, 0)),
                    pl.BlockSpec(memory_space=pltpu.MemorySpace.SMEM),
                ],
                out_specs=pl.BlockSpec((None, n_out, l_tile),
                                       lambda i: (i, 0, 0)),
                scratch_shapes=[
                    pltpu.VMEM((ksize * n_in, l_tile), jnp.bfloat16),
                ]),
            compiler_params=pltpu.CompilerParams(
                dimension_semantics=("parallel",),
                vmem_limit_bytes=vmem_limit),
        )(x_work, w_flat, bias, gamma, beta, alpha)
        return out[:, :, :length] if l_tile != length else out

    # -------------------- Path B: L-tiled, two passes ------------------------
    if l_block is None:
        l_block = 1024
    l_block = max(128, 128 * (l_block // 128))
    l_block = min(l_block, 128 * pl.cdiv(length, 128))
    l_padded = l_block * pl.cdiv(length, l_block)
    n_lt = l_padded // l_block

    x_work = _pad_input(x, l_padded)
    w3 = jnp.transpose(weight, (2, 0, 1)).astype(jnp.bfloat16)  # (K, nOut, nIn)

    vmem1 = (2 * n_in * (l_padded + 2 * _HALO) * 2
             + 2 * ksize * n_out * n_in * 2
             + 2 * n_out * l_block * 4
             + (ksize + 2) * n_in * l_block * 2
             + n_out * l_block * 4)
    vmem1 = int(min(max(vmem1 * 3 // 2 + (4 << 20), 32 << 20), 128 << 20))

    kernel1 = functools.partial(_conv_stats_kernel, ksize=ksize,
                                l_block=l_block, l_valid=length,
                                l_padded=l_padded)
    y, part = pl.pallas_call(
        kernel1,
        out_shape=(jax.ShapeDtypeStruct((b, n_out, l_padded), jnp.float32),
                   jax.ShapeDtypeStruct((b, n_lt, 1, 2), jnp.float32)),
        grid_spec=pltpu.PrefetchScalarGridSpec(
            num_scalar_prefetch=0,
            grid=(b, n_lt),
            in_specs=[
                pl.BlockSpec((None, n_in, l_padded + 2 * _HALO),
                             lambda i, j: (i, 0, 0)),
                pl.BlockSpec((ksize, n_out, n_in), lambda i, j: (0, 0, 0)),
                pl.BlockSpec((n_out, 1), lambda i, j: (0, 0)),
            ],
            out_specs=[
                pl.BlockSpec((None, n_out, l_block), lambda i, j: (i, 0, j)),
                pl.BlockSpec((None, None, 1, 2), lambda i, j: (i, j, 0, 0)),
            ]),
        compiler_params=pltpu.CompilerParams(
            dimension_semantics=("parallel", "parallel"),
            vmem_limit_bytes=vmem1),
    )(x_work, w3, bias)

    # Tiny combine of the per-tile partials (plain jnp, negligible cost).
    # TODO(synk): single-pass E[x^2]-mean^2 can cancel at extreme C*L scales;
    # switch to a centered second pass / Welford merge if that ever matters.
    tot = jnp.sum(part.reshape(b, n_lt, 2), axis=1)          # (B, 2)
    inv_n = 1.0 / float(n_out * length)
    mean = tot[:, 0] * inv_n
    var = tot[:, 1] * inv_n - mean * mean
    inv_std = lax.rsqrt(jnp.maximum(var, 0.0) + _EPS)
    stats = jnp.stack([mean, inv_std], axis=1)               # (B, 2)

    vmem2 = 6 * n_out * l_block * 4
    vmem2 = int(min(max(vmem2 * 3 // 2 + (4 << 20), 32 << 20), 128 << 20))
    out = pl.pallas_call(
        _norm_act_kernel,
        out_shape=jax.ShapeDtypeStruct((b, n_out, l_padded), jnp.float32),
        grid_spec=pltpu.PrefetchScalarGridSpec(
            num_scalar_prefetch=0,
            grid=(b, n_lt),
            in_specs=[
                pl.BlockSpec(memory_space=pltpu.MemorySpace.SMEM),   # stats (B,2)
                pl.BlockSpec((None, n_out, l_block), lambda i, j: (i, 0, j)),
                pl.BlockSpec((n_out, 1), lambda i, j: (0, 0)),
                pl.BlockSpec((n_out, 1), lambda i, j: (0, 0)),
                pl.BlockSpec(memory_space=pltpu.MemorySpace.SMEM),   # alpha (1,)
            ],
            out_specs=pl.BlockSpec((None, n_out, l_block),
                                   lambda i, j: (i, 0, j))),
        compiler_params=pltpu.CompilerParams(
            dimension_semantics=("parallel", "parallel"),
            vmem_limit_bytes=vmem2),
    )(stats, y, gamma, beta, alpha)

    return out[:, :, :length] if l_padded != length else out


def _reference(x, weight, bias, gamma, beta, alpha, *, ksize):
    """Pure-JAX reference mirroring PyTorch Conv1d + GroupNorm(1,C) + PReLU."""
    pad = (ksize - 1) // 2
    y = lax.conv_general_dilated(
        x, weight, window_strides=(1,), padding=[(pad, pad)],
        dimension_numbers=("NCH", "OIH", "NCH"))
    y = y + bias.reshape(1, -1, 1)
    mean = jnp.mean(y, axis=(1, 2), keepdims=True)
    var = jnp.mean((y - mean) ** 2, axis=(1, 2), keepdims=True)
    y = (y - mean) / jnp.sqrt(var + _EPS)
    y = y * gamma.reshape(1, -1, 1) + beta.reshape(1, -1, 1)
    a = jnp.reshape(alpha, ())
    return jnp.where(y >= 0, y, a * y)


if __name__ == "__main__":
    # Small shapes consistent with the module: ConvNormAct(nIn=4, nOut=8, kSize=3)
    B, nIn, nOut, K, L = 2, 4, 8, 3, 16

    key = jax.random.PRNGKey(0)
    kx, kx2, kw, kb, kg, kbe = jax.random.split(key, 6)

    x = jax.random.normal(kx, (B, nIn, L), dtype=jnp.float32)

    fan_in = nIn * K
    bound = 1.0 / np.sqrt(fan_in)
    weight = jax.random.uniform(kw, (nOut, nIn, K), jnp.float32, -bound, bound)
    bias = jax.random.uniform(kb, (nOut,), jnp.float32, -bound, bound)
    gamma = jnp.ones((nOut,), jnp.float32) + 0.1 * jax.random.normal(
        kg, (nOut,), jnp.float32)
    beta = 0.1 * jax.random.normal(kbe, (nOut,), jnp.float32)
    alpha = jnp.full((1,), 0.25, jnp.float32)  # PReLU default init

    # Path A: fused single-pass kernel (small L fits VMEM).
    out = jax.block_until_ready(
        conv_norm_act(x, weight, bias, gamma, beta, alpha, ksize=K))
    ref = _reference(x, weight, bias, gamma, beta, alpha, ksize=K)
    np.testing.assert_allclose(np.asarray(out), np.asarray(ref),
                               rtol=3e-2, atol=3e-2)

    # Path B: forced L-tiled two-pass path (production-shape fallback),
    # 3 tiles of 128 with a ragged last tile to exercise the stats masking.
    L2 = 320
    x2 = jax.random.normal(kx2, (B, nIn, L2), dtype=jnp.float32)
    out2 = jax.block_until_ready(
        conv_norm_act(x2, weight, bias, gamma, beta, alpha, ksize=K,
                      l_block=128, force_tiled=True))
    ref2 = _reference(x2, weight, bias, gamma, beta, alpha, ksize=K)
    np.testing.assert_allclose(np.asarray(out2), np.asarray(ref2),
                               rtol=3e-2, atol=3e-2)

    print("KERNEL_OK")
</pallas_src>

<mosaic_0001>
module attributes {stable_mosaic.version = 11 : i64} {
  func.func @_fused_kernel(%arg0: i32, %arg1: memref<1x4x384xbf16, #tpu.memory_space<vmem>>, %arg2: memref<8x12xbf16, #tpu.memory_space<vmem>>, %arg3: memref<8x1xf32, #tpu.memory_space<vmem>>, %arg4: memref<8x1xf32, #tpu.memory_space<vmem>>, %arg5: memref<8x1xf32, #tpu.memory_space<vmem>>, %arg6: memref<1xf32, #tpu.memory_space<smem>>, %arg7: memref<1x8x128xf32, #tpu.memory_space<vmem>>, %arg8: memref<12x128xbf16, #tpu.memory_space<vmem>>) attributes {dimension_semantics = [#tpu.dimension_semantics<parallel>], iteration_bounds = array<i64: 2>, scalar_prefetch = 0 : i64, scratch_operands = 1 : i64, tpu.core_type = #tpu.core_type<tc>, window_params = [{transform_indices = @transform_0, window_bounds = array<i64: 1, 4, 384>}, {pipeline_mode = #tpu.pipeline_mode<synchronous>, transform_indices = @transform_1, window_bounds = array<i64: 8, 12>}, {pipeline_mode = #tpu.pipeline_mode<synchronous>, transform_indices = @transform_2, window_bounds = array<i64: 8, 1>}, {pipeline_mode = #tpu.pipeline_mode<synchronous>, transform_indices = @transform_3, window_bounds = array<i64: 8, 1>}, {pipeline_mode = #tpu.pipeline_mode<synchronous>, transform_indices = @transform_4, window_bounds = array<i64: 8, 1>}, {transform_indices = @transform_5, window_bounds = array<i64: 1>}, {transform_indices = @transform_6, window_bounds = array<i64: 1, 8, 128>}]} {
    %c0 = arith.constant 0 : index
    %c0_0 = arith.constant 0 : index
    %c127 = arith.constant 127 : index
    %0 = vector.load %arg1[%c0, %c0_0, %c127] : memref<1x4x384xbf16, #tpu.memory_space<vmem>>, vector<1x4x128xbf16>
    %1 = vector.shape_cast %0 : vector<1x4x128xbf16> to vector<4x128xbf16>
    %c0_1 = arith.constant 0 : index
    %c0_2 = arith.constant 0 : index
    %2 = vector.load %arg8[%c0_1, %c0_2] : memref<12x128xbf16, #tpu.memory_space<vmem>>, vector<4x128xbf16>
    tpu.vector_store %arg8[%c0_1, %c0_2], %1 {strides = array<i32>} : memref<12x128xbf16, #tpu.memory_space<vmem>>, vector<4x128xbf16>,
    %c0_3 = arith.constant 0 : index
    %c0_4 = arith.constant 0 : index
    %c128 = arith.constant 128 : index
    %3 = vector.load %arg1[%c0_3, %c0_4, %c128] : memref<1x4x384xbf16, #tpu.memory_space<vmem>>, vector<1x4x128xbf16>
    %4 = vector.shape_cast %3 : vector<1x4x128xbf16> to vector<4x128xbf16>
    %c4 = arith.constant 4 : index
    %c0_5 = arith.constant 0 : index
    %5 = vector.load %arg8[%c4, %c0_5] : memref<12x128xbf16, #tpu.memory_space<vmem>>, vector<4x128xbf16>
    tpu.vector_store %arg8[%c4, %c0_5], %4 {strides = array<i32>} : memref<12x128xbf16, #tpu.memory_space<vmem>>, vector<4x128xbf16>,
    %c0_6 = arith.constant 0 : index
    %c0_7 = arith.constant 0 : index
    %c129 = arith.constant 129 : index
    %6 = vector.load %arg1[%c0_6, %c0_7, %c129] : memref<1x4x384xbf16, #tpu.memory_space<vmem>>, vector<1x4x128xbf16>
    %7 = vector.shape_cast %6 : vector<1x4x128xbf16> to vector<4x128xbf16>
    %c8 = arith.constant 8 : index
    %c0_8 = arith.constant 0 : index
    %8 = vector.load %arg8[%c8, %c0_8] : memref<12x128xbf16, #tpu.memory_space<vmem>>, vector<4x128xbf16>
    tpu.vector_store %arg8[%c8, %c0_8], %7 {strides = array<i32>} : memref<12x128xbf16, #tpu.memory_space<vmem>>, vector<4x128xbf16>,
    %c0_9 = arith.constant 0 : index
    %c0_10 = arith.constant 0 : index
    %9 = vector.load %arg2[%c0_9, %c0_10] : memref<8x12xbf16, #tpu.memory_space<vmem>>, vector<8x12xbf16>
    %c0_11 = arith.constant 0 : index
    %c0_12 = arith.constant 0 : index
    %10 = vector.load %arg8[%c0_11, %c0_12] : memref<12x128xbf16, #tpu.memory_space<vmem>>, vector<12x128xbf16>
    %cst = arith.constant dense<0.000000e+00> : vector<8x128xf32>
    %11 = tpu.matmul %9, %10, %cst {dimension_numbers = #tpu.dot_dimension_numbers<[1], [0], [0], [1], [0, 0, 1, 1], [], []>} : vector<8x12xbf16>, vector<12x128xbf16>, vector<8x128xf32> -> vector<8x128xf32>
    %c0_13 = arith.constant 0 : index
    %c0_14 = arith.constant 0 : index
    %12 = vector.load %arg3[%c0_13, %c0_14] : memref<8x1xf32, #tpu.memory_space<vmem>>, vector<8x1xf32>
    %13 = vector.broadcast %12 : vector<8x1xf32> to vector<8x128xf32>
    %14 = arith.addf %11, %13 : vector<8x128xf32>
    %c0_15 = arith.constant 0 : index
    %c0_16 = arith.constant 0 : index
    %c0_17 = arith.constant 0 : index
    %15 = vector.load %arg7[%c0_15, %c0_16, %c0_17] : memref<1x8x128xf32, #tpu.memory_space<vmem>>, vector<1x8x128xf32>
    %16 = vector.shape_cast %15 : vector<1x8x128xf32> to vector<8x128xf32>
    %17 = vector.shape_cast %14 : vector<8x128xf32> to vector<1x8x128xf32>
    tpu.vector_store %arg7[%c0_15, %c0_16, %c0_17], %17 {strides = array<i32>} : memref<1x8x128xf32, #tpu.memory_space<vmem>>, vector<1x8x128xf32>,
    %c0_18 = arith.constant 0 : index
    %c0_19 = arith.constant 0 : index
    %c0_20 = arith.constant 0 : index
    %18 = vector.load %arg7[%c0_18, %c0_19, %c0_20] : memref<1x8x128xf32, #tpu.memory_space<vmem>>, vector<1x8x128xf32>
    %19 = vector.shape_cast %18 : vector<1x8x128xf32> to vector<8x128xf32>
    %20 = tpu.iota {dimensions = array<i32: 1>} : vector<8x128xi32>
    %c16_i32 = arith.constant 16 : i32
    %21 = vector.broadcast %c16_i32 : i32 to vector<8x128xi32>
    %22 = arith.cmpi slt, %20, %21 : vector<8x128xi32>
    %cst_21 = arith.constant 0.000000e+00 : f32
    %23 = vector.broadcast %cst_21 : f32 to vector<8x128xf32>
    %24 = arith.select %22, %19, %23 : vector<8x128xi1>, vector<8x128xf32>
    %25 = vector.shape_cast %24 : vector<8x128xf32> to vector<1x8x128xf32>
    %cst_22 = arith.constant dense<0.000000e+00> : vector<1xf32>
    %26 = vector.multi_reduction <add>, %25, %cst_22 [1, 2] : vector<1x8x128xf32> to vector<1xf32>
    %27 = vector.shape_cast %26 : vector<1xf32> to vector<1x1x1xf32>
    %28 = vector.extract %27[0, 0, 0] : f32 from vector<1x1x1xf32>
    %cst_23 = arith.constant 7.812500e-03 : f32
    %29 = arith.mulf %28, %cst_23 : f32
    %30 = vector.broadcast %29 : f32 to vector<8x128xf32>
    %31 = arith.subf %19, %30 : vector<8x128xf32>
    %32 = arith.mulf %31, %31 : vector<8x128xf32>
    %cst_24 = arith.constant 0.000000e+00 : f32
    %33 = vector.broadcast %cst_24 : f32 to vector<8x128xf32>
    %34 = arith.select %22, %32, %33 : vector<8x128xi1>, vector<8x128xf32>
    %35 = vector.shape_cast %34 : vector<8x128xf32> to vector<1x8x128xf32>
    %cst_25 = arith.constant dense<0.000000e+00> : vector<1xf32>
    %36 = vector.multi_reduction <add>, %35, %cst_25 [1, 2] : vector<1x8x128xf32> to vector<1xf32>
    %37 = vector.shape_cast %36 : vector<1xf32> to vector<1x1x1xf32>
    %38 = vector.extract %37[0, 0, 0] : f32 from vector<1x1x1xf32>
    %cst_26 = arith.constant 7.812500e-03 : f32
    %39 = arith.mulf %38, %cst_26 : f32
    %cst_27 = arith.constant 0.000000e+00 : f32
    %40 = arith.maximumf %39, %cst_27 : f32
    %cst_28 = arith.constant 9.99999993E-9 : f32
    %41 = arith.addf %40, %cst_28 : f32
    %42 = math.rsqrt %41 : f32
    %c0_29 = arith.constant 0 : index
    %c0_30 = arith.constant 0 : index
    %43 = vector.load %arg4[%c0_29, %c0_30] : memref<8x1xf32, #tpu.memory_space<vmem>>, vector<8x1xf32>
    %44 = vector.broadcast %42 : f32 to vector<8x1xf32>
    %45 = arith.mulf %43, %44 : vector<8x1xf32>
    %46 = vector.broadcast %45 : vector<8x1xf32> to vector<8x128xf32>
    %47 = arith.mulf %31, %46 : vector<8x128xf32>
    %c0_31 = arith.constant 0 : index
    %c0_32 = arith.constant 0 : index
    %48 = vector.load %arg5[%c0_31, %c0_32] : memref<8x1xf32, #tpu.memory_space<vmem>>, vector<8x1xf32>
    %49 = vector.broadcast %48 : vector<8x1xf32> to vector<8x128xf32>
    %50 = arith.addf %47, %49 : vector<8x128xf32>
    %c0_33 = arith.constant 0 : index
    %51 = memref.load %arg6[%c0_33] : memref<1xf32, #tpu.memory_space<smem>>
    %cst_34 = arith.constant 0.000000e+00 : f32
    %52 = vector.broadcast %cst_34 : f32 to vector<8x128xf32>
    %53 = arith.cmpf oge, %50, %52 : vector<8x128xf32>
    %54 = vector.broadcast %51 : f32 to vector<8x128xf32>
    %55 = arith.mulf %54, %50 : vector<8x128xf32>
    %56 = arith.select %53, %50, %55 : vector<8x128xi1>, vector<8x128xf32>
    %c0_35 = arith.constant 0 : index
    %c0_36 = arith.constant 0 : index
    %c0_37 = arith.constant 0 : index
    %57 = vector.load %arg7[%c0_35, %c0_36, %c0_37] : memref<1x8x128xf32, #tpu.memory_space<vmem>>, vector<1x8x128xf32>
    %58 = vector.shape_cast %57 : vector<1x8x128xf32> to vector<8x128xf32>
    %59 = vector.shape_cast %56 : vector<8x128xf32> to vector<1x8x128xf32>
    tpu.vector_store %arg7[%c0_35, %c0_36, %c0_37], %59 {strides = array<i32>} : memref<1x8x128xf32, #tpu.memory_space<vmem>>, vector<1x8x128xf32>,
    return
  }
  func.func @transform_0(%arg0: i32) -> (i32, i32, i32) {
    %c0_i32 = arith.constant 0 : i32
    %c0_i32_0 = arith.constant 0 : i32
    %c0_i32_1 = arith.constant 0 : i32
    return %arg0, %c0_i32, %c0_i32_0 : i32, i32, i32
  }
  func.func @transform_1(%arg0: i32) -> (i32, i32) {
    %c0_i32 = arith.constant 0 : i32
    %c0_i32_0 = arith.constant 0 : i32
    %c0_i32_1 = arith.constant 0 : i32
    return %c0_i32, %c0_i32_0 : i32, i32
  }
  func.func @transform_2(%arg0: i32) -> (i32, i32) {
    %c0_i32 = arith.constant 0 : i32
    %c0_i32_0 = arith.constant 0 : i32
    %c0_i32_1 = arith.constant 0 : i32
    return %c0_i32, %c0_i32_0 : i32, i32
  }
  func.func @transform_3(%arg0: i32) -> (i32, i32) {
    %c0_i32 = arith.constant 0 : i32
    %c0_i32_0 = arith.constant 0 : i32
    %c0_i32_1 = arith.constant 0 : i32
    return %c0_i32, %c0_i32_0 : i32, i32
  }
  func.func @transform_4(%arg0: i32) -> (i32, i32) {
    %c0_i32 = arith.constant 0 : i32
    %c0_i32_0 = arith.constant 0 : i32
    %c0_i32_1 = arith.constant 0 : i32
    return %c0_i32, %c0_i32_0 : i32, i32
  }
  func.func @transform_5(%arg0: i32) -> i32 {
    %c0_i32 = arith.constant 0 : i32
    %c0_i32_0 = arith.constant 0 : i32
    return %c0_i32 : i32
  }
  func.func @transform_6(%arg0: i32) -> (i32, i32, i32) {
    %c0_i32 = arith.constant 0 : i32
    %c0_i32_0 = arith.constant 0 : i32
    %c0_i32_1 = arith.constant 0 : i32
    return %arg0, %c0_i32, %c0_i32_0 : i32, i32, i32
  }
}

</mosaic_0001>

<bundles_post_ra>
// kernel: tpu_custom_call.1
= control target key start
LH: loop header
LB: loop body
LE: loop exit
PB: predicated region body
PF: predicated region fallthrough
CT: control target
= control target key end

     0   :  { %s783_s0 = inlined_call_operand.vmem [shape: bf16[2,4,384], index: 0, kind: input, shape index: {}]   ;;  %s784_s1 = inlined_call_operand.vmem [shape: bf16[8,12], index: 1, kind: input, shape index: {}]   ;;  %s785_s2 = inlined_call_operand.vmem [shape: f32[8,1], index: 2, kind: input, shape index: {}]   ;;  %s786_s3 = inlined_call_operand.vmem [shape: f32[8,1], index: 3, kind: input, shape index: {}]   ;;  %s787_s4 = inlined_call_operand.vmem [shape: f32[8,1], index: 4, kind: input, shape index: {}]   ;;  %s788_s5 = inlined_call_operand.<no memory space> [shape: f32[1], index: 5, kind: input, shape index: {}]   ;;  %s789_s6 = inlined_call_operand.hbm [shape: f32[2,8,128], index: 6, kind: output, shape index: {}]  }
   0x1   :  { %11 = sst [smem:[#allocation3]] %s788_s5 }
   0x2   :  { %12 = vsyncpa [#allocation5], 0 }
   0x3   :  { %14 = vsyncpa [#allocation5 + $0x1], 0  ;;  %s676_s23 = smov 0   ;;  %s678_s24 = smov 0  }
   0x4   :  { %s680_s25 = smov 0   ;;  %s682_s26 = smov 0  }
   0x5 LB: > { %s697_s5 = sadd.s32 4294967295, %s629_s26   ;;  %s488_s27 = sadd.s32 4294967294, %s629_s26   ;;  %s629_s26 = sphi %s682_s26, %s795_s26   ;;  %s625_s25 = sphi %s680_s25, %s794_s25   ;;  %s621_s24 = sphi %s678_s24, %s793_s24   ;;  %s617_s23 = sphi %s676_s23, %s792_s23  }
   0x6   : > { %s701_s28 = sadd.s32 1, %s629_s26   ;;  %s158_s29 = sadd.s32 1, %s625_s25 }
   0x7   : > { %s155_s30 = ssub.s32 %s629_s26, %s701_s28  ;;  %p168_p0 = scmp.ne.s32.totalorder %s625_s25, %s621_s24 }
   0x8   : > { %p156_p1 = scmp.eq.s32.totalorder %s155_s30, 0  ;;  %p169_p2 = scmp.eq.s32.totalorder %s697_s5, 1 }
   0x9   : > { %p174_p3 = scmp.ne.s32.totalorder %s621_s24, %s617_s23  ;;  %p175_p4 = scmp.eq.s32.totalorder %s488_s27, 1 }
   0xa   : > { %s712_s7 = scalar_select %p156_p1, %s625_s25, %s158_s29  }
   0xb   : > { %p714_p5 = por %p169_p2, %p168_p0  ;;  %p718_p6 = por %p175_p4, %p174_p3 }
   0xc   : > { %p491_p7 = scmp.ge.s32.totalorder %s629_s26, 1  ;;  %p216_p8 = scmp.lt.s32.totalorder %s629_s26, 3 }
   0xe   : > { %p217_p9 = pnand %p491_p7, %p216_p8 }
   0xf   : > { %p246_p10 = scmp.lt.s32.totalorder (!%p217_p9), %s697_s5, 1  ;;  %s632_s15 = smov (!%p217_p9), 1  }
  0x10   : > { %220 = sbr.rel (%p217_p9) target bundleno = 982 (0x3d6), region = 44  ;;  %s633_s16 = smov (!%p217_p9), 127  }
  0x11   : > { %s243_s17 = sand.u32 (!%p217_p9), 1, %s621_s24   ;;  %s409_s18 = sld [smem:[#allocation3]] (!%p217_p9) }
  0x12   : > { %s492_s19 = sshll.u32 (!%p217_p9), %s243_s17, 3  ;;  %s500_s20 = sshll.u32 (!%p217_p9), %s697_s5, 7 }
  0x13   : > { %s245_s21 = scalar_lea.vmem (!%p217_p9), [#allocation4], %s492_s19 }
  0x14   : > { %s429_s22 = sshll.u32 (!%p217_p9), %s245_s21, 4  ;;  %s430_s22 = int_to_ptr.vmem [resolvable:$true] %s429_s22 }
  0x15   : > { %s247_s10 = scalar_select %p246_p10, %s697_s5, 1  ;;  %v631_v0 = vmov 0.0   ;;  %vm634_vm0 = vmmov 0   ;;  %v299_v4 = vld [vmem:[%s785_s2] sm:$0xff]  ;;  %v635_v5 = vmov 0   ;;  %vm264_vm1 = vcmask 7168  }
  0x16   : > { %505 = vmatprep.subr.bf16.mxu0 %v631_v0  ;;  %507 = vmatprep.mubr.msk.bf16.mxu0 %vm634_vm0, %v631_v0  ;;  %vm292_vm2 = vcmask 1039360   ;;  %vm314_vm3 = vcmask 1045504   ;;  %v296_v14 = vld [vmem:[%s784_s1] sm:$0xf]  ;;  %vm310_vm4 = vcmask 97280   ;;  %v360_v15 = vlaneseq }
  0x17   : > { %s511_s11 = smul.u32 6, %s247_s10  ;;  %563 = vset.pattern.permute.xlu1 %v635_v5  ;;  %564 = vset.pattern.permute.xlu0 %v635_v5  ;;  %v402_v24 = vld [vmem:[%s787_s4] sm:$0xff]  ;;  %v411_v51 = vstv %s409_s18 }
  0x18   : > { %302 = vperm.xlu1 %563, %v299_v4   ;;  %v361_v16 = vand.u32 127, %v360_v15  ;;  %v393_v45 = vld [vmem:[%s786_s3] sm:$0xff] }
  0x19   : > { %s250_s14 = scalar_lea.vmem %s783_s0, %s511_s11  ;;  %s636_s11 = smov 0.0  }
  0x1a   : > { %v494_v1 = vld.sshfl [vmem:[%s250_s14] sm:$0x33 pattern:$0x76325410]  ;;  %vm362_vm5 = vcmp.lt.s32.totalorder %v361_v16, 16 }
  0x1b   : > { %v565_v2 = vld [vmem:[%s250_s14 + $0x2] ss:$0 sps:$4 sm:$0x33]   ;;  %261 = vrot.lane.b32.xlu0 %v494_v1, %s632_s15 }
  0x1c   : > { %v496_v3 = vld.sshfl [vmem:[%s250_s14 + $0x2] sm:$0x33 pattern:$0x76325410] }
  0x1d   : > { %495 = vst.sshfl [vmem:[#allocation2] sm:$0x30 pattern:$0x76325410] %v565_v2 }
  0x1f   : > { %289 = vrot.lane.b32.xlu0 %v496_v3, %s633_s16 }
  0x8d   : > { %v262_v6 = vpop.permute.xlu0 %261 }
  0x8e   : > { %v263_v7 = vrot.slane %v262_v6, 4 }
  0x90   : > { %v265_v8 = vsel %vm264_vm1, %v262_v6, %v263_v7 }
  0x91   : > { %267 = vst [vmem:[#allocation2] sm:$0x3] %v265_v8  ;;  %v290_v9 = vpop.permute.xlu0 %289 }
  0x92   : > { %v291_v10 = vrot.slane %v290_v9, 4 }
  0x93   : > { %v303_v17 = vpop.permute.xlu1 %302 }
  0x94   : > { %v293_v11 = vsel %vm292_vm2, %v290_v9, %v291_v10 }
  0x95   : > { %295 = vst [vmem:[#allocation2 + $0x4] sm:$0x3] %v293_v11 }
  0x9c   : > { %v566_v12 = vld [vmem:[#allocation2] sm:$0x3f]  }
  0x9d   : > { %v316_v13 = vsel %vm314_vm3, %v566_v12, 0 }
  0x9e   : > { %506 = vmatpush3.bf16.msra.mxu0 %v316_v13 }
  0xa1   : > { %508 = vmatmul.mubr.msk.bf16.vlgmr.msra.gmra.mxu0 %vm310_vm4, %v296_v14 }
 0x161   : > { %v352_v18 = vpop.f32.mrf.mxu0 }
 0x162   : > { %v353_v19 = vadd.f32 %v352_v18, %v303_v17 }
 0x163   : > { %v509_v20 = vpop.f32.mrf.mxu0 }
 0x164   : > { %v363_v21 = vsel %vm362_vm5, %v353_v19, 0.0 }
 0x165   : > { %v355_v22 = vpop.f32.mrf.mxu0  ;;  %364 = vadd.xlane.f32.xlu1 %v363_v21 }
 0x167   : > { %v510_v23 = vpop.f32.mrf.mxu0 }
 0x176   : > { %405 = vperm.xlu1 %563, %v402_v24  }
 0x1ee   : > { %v365_v25 = vpop.xlane.xlu1 %364 }
 0x1ef   : > { %v366_v26 = vrot.slane %v365_v25, 4 }
 0x1f1   : > { %v367_v27 = vadd.f32 %v366_v26, %v365_v25 }
 0x1f2   : > { %v406_v50 = vpop.permute.xlu1 %405 }
 0x1f3   : > { %v368_v28 = vrot.slane %v367_v27, 2 }
 0x1f5   : > { %v369_v29 = vadd.f32 %v368_v28, %v367_v27 }
 0x1f7   : > { %v370_v30 = vrot.slane %v369_v29, 1 }
 0x1f9   : > { %v371_v31 = vadd.f32 %v370_v30, %v369_v29 }
 0x1fb   : > { %512 = vpush %v371_v31 }
 0x22c   : > { %s513_s27 = spop %512 }
 0x22d   : > { %s373_s29 = smul.f32 0.0078125, %s513_s27 }
 0x22f   : > { %v374_v32 = vstv %s373_s29 }
 0x230   : > { %v375_v33 = vsub.f32 %v353_v19, %v374_v32 }
 0x232   : > { %v376_v34 = vmul.f32 %v375_v33, %v375_v33 }
 0x234   : > { %v377_v35 = vsel %vm362_vm5, %v376_v34, 0.0 }
 0x235   : > { %378 = vadd.xlane.f32.xlu0 %v377_v35 }
 0x2be   : > { %v379_v36 = vpop.xlane.xlu0 %378 }
 0x2bf   : > { %v380_v37 = vrot.slane %v379_v36, 4 }
 0x2c1   : > { %v381_v38 = vadd.f32 %v380_v37, %v379_v36 }
 0x2c3   : > { %v382_v39 = vrot.slane %v381_v38, 2 }
 0x2c5   : > { %v383_v40 = vadd.f32 %v382_v39, %v381_v38 }
 0x2c7   : > { %v384_v41 = vrot.slane %v383_v40, 1 }
 0x2c9   : > { %v385_v42 = vadd.f32 %v384_v41, %v383_v40 }
 0x2cb   : > { %514 = vpush %v385_v42 }
 0x2fc   : > { %s515_s30 = spop %514 }
 0x2fd   : > { %s387_s10 = smul.f32 0.0078125, %s515_s30  ;;  %s748_s30 = scalar_lea.hbm %s789_s6, %s500_s20 }
 0x2ff   : > { %s388_s12 = smax.f32 %s636_s11, %s387_s10  ;;  %s416_s10 = scalar_lea.sflag [#allocation5], %s243_s17 }
 0x300   : > { %s389_s13 = sadd.f32 1e-08, %s388_s12  ;;  %s569_s11 = scalar_lea.vmem %s430_s22, 128 }
 0x301   : > { %p570_p11 = scmp.ne.s32.totalorder %s430_s22, %s569_s11  ;;  %s637_s12 = smov [#allocation4]  }
 0x302   : > { %v390_v43 = vstv %s389_s13  ;;  %s573_s5 = sshll.u32 %s637_s12, 4  ;;  %s574_s5 = int_to_ptr.vmem [resolvable:$false] %s573_s5 }
 0x303   : > { %567 = vrsqrt.f32 %v390_v43  ;;  %p571_p12 = pnand %p570_p11, %p714_p5  ;;  %s575_s13 = scalar_lea.vmem %s574_s5, 256 }
 0x304   : > { %p576_p0 = scmp.lt.s32.totalorder %s430_s22, %s574_s5  ;;  %p577_p1 = scmp.lt.s32.totalorder %s575_s13, %s569_s11 }
 0x305   : > { %p572_p13 = pneg %p571_p12 }
 0x306   : > { %p578_p2 = por %p577_p1, %p576_p0 }
 0x308   : > { %p579_p3 = pnand %p578_p2, %p572_p13 }
 0x310   : > { %v568_v44 = vpop.eup %567 }
 0x311   : > { %516 = vpush %v568_v44 }
 0x342   : > { %s517_s16 = spop %516 }
 0x343   : > { %v394_v46 = vstv %s517_s16 }
 0x344   : > { %v395_v47 = vmul.f32 %v394_v46, %v393_v45 }
 0x346   : > { %398 = vperm.xlu0 %564, %v395_v47  }
 0x3c1   : > { %v399_v48 = vpop.permute.xlu0 %398 }
 0x3c2   : > { %v401_v49 = vmul.f32 %v399_v48, %v375_v33 }
 0x3c4   : > { %v408_v52 = vadd.f32 %v406_v50, %v401_v49 }
 0x3c6   : > { %vm410_vm6 = vcmp.ge.f32.partialorder %v408_v52, 0.0  ;;  %v412_v53 = vmul.f32 %v411_v51, %v408_v52 }
 0x3c8   : > { %v413_v54 = vsel %vm410_vm6, %v408_v52, %v412_v53 }
 0x3c9   : > { %414 = vst [vmem:[%s245_s21] sm:$0xff] %v413_v54 }
 0x3ca   : > { %582 = shalt.err (!%p579_p3)
}
 0x3cb   : > { %s583_s14 = scalar_lea.hbm %s748_s30, 128  ;;  %s587_s17 = scalar_lea.hbm %s789_s6, 256 }
 0x3cc   : > { %p584_p4 = scmp.ne.s32.totalorder %s748_s30, %s583_s14  ;;  %p588_p9 = scmp.lt.s32.totalorder %s748_s30, %s789_s6 }
 0x3cd   : > { %p589_p10 = scmp.lt.s32.totalorder %s587_s17, %s583_s14 }
 0x3ce   : > { %p585_p7 = pnand %p584_p4, %p714_p5 }
 0x3cf   : > { %p590_p11 = por %p589_p10, %p588_p9 }
 0x3d0   : > { %p586_p8 = pneg %p585_p7 }
 0x3d2   : > { %p591_p12 = pnand %p590_p11, %p586_p8 }
 0x3d4   : > { %594 = shalt.err (!%p591_p12)
}
 0x3d5   : > { %518 = dma.vmem_to_hbm [thread:$0]  (%p714_p5), %s430_s22, 128, %s748_s30, %s416_s10  }
 0x3d6 PF: > { %p524_p13 = scmp.ge.s32.totalorder %s629_s26, 2  ;;  %s441_s20 = sand.u32 1, %s617_s23  }
 0x3d7   : > { %s442_s21 = scalar_lea.sflag [#allocation5], %s441_s20 }
 0x3d8   : > { %p521_p0 = pnand %p524_p13, %p718_p6 }
 0x3da   : > { %p522_p1 = pneg %p521_p0 }
 0x3dc   : > { %612 = dma.done.wait (%p522_p1), %s442_s21, 128  }
 0x3dd   : > { %614 = vsyncadd (%p522_p1), %s442_s21, 4294967168  ;;  %p17_p2 = scmp.ge.s32.totalorder %s701_s28, 4   ;;  %s792_s23 = smov %s621_s24 }
 0x3de   : > { %s793_s24 = smov %s625_s25  ;;  %s794_s25 = smov %s712_s7 }
 0x3df   : > { %s795_s26 = smov %s701_s28  ;;  %19 = sbr.rel (!%p17_p2) target bundleno = 5 (0x5), region = 79 }
 0x3e4   :  { %447 = vsyncpa [#allocation5], 1 }
 0x3e5   :  { %449 = vsyncpa [#allocation5 + $0x1], 1 }

</bundles_post_ra>
